<compile_context>
chip_gen: v5e
topology: v5e:2x2
jax: 0.10.0
libtpu: 0.0.40
codegen_flags: <defaults>
</compile_context>

<pallas_src>
import functools

import jax
import jax.numpy as jnp
from jax.experimental import pallas as pl
from jax.experimental.pallas import tpu as pltpu


def _cdiv(a, b):
    return (a + b - 1) // b


def _round_up(a, b):
    return _cdiv(a, b) * b


def _vmem_capacity_bytes():
    try:
        return int(pltpu.get_tpu_info().vmem_capacity_bytes)
    except Exception:
        # Conservative fallback = v7x per-TC VMEM; v5e/v6e have 128 MiB.
        return 64 * 1024 * 1024


def _rmsnorm_kernel(x_ref, w_ref, o_ref, *, eps, hidden, mask_lanes):
    # x_ref: (block_rows, hidden), w_ref: (1, hidden)
    x = x_ref[...]
    input_dtype = x.dtype
    xf = x.astype(jnp.float32)
    if mask_lanes:
        # hidden is not a multiple of 128: zero any physical lane padding so it
        # cannot leak into the sum of squares (no-op on logical lanes < hidden).
        lane = jax.lax.broadcasted_iota(jnp.int32, xf.shape, dimension=xf.ndim - 1)
        xf = jnp.where(lane < hidden, xf, 0.0)
    # Mean over the true hidden size.
    ssq = jnp.sum(xf * xf, axis=-1, keepdims=True)
    variance = ssq * (1.0 / float(hidden))
    normed = xf * jax.lax.rsqrt(variance + eps)
    # Match PyTorch: weight * hidden_states.to(input_dtype)
    out = w_ref[...] * normed.astype(input_dtype)
    o_ref[...] = out.astype(o_ref.dtype)


def rmsnorm(x, weight, eps=1e-6, block_rows=None, out_dtype=None):
    """x: [..., hidden] array, weight: [hidden]."""
    orig_shape = x.shape
    hidden = int(orig_shape[-1])
    rows = 1
    for d in orig_shape[:-1]:
        rows *= int(d)
    rows = max(rows, 1)

    # Contiguous reshapes only — no HBM copies in the wrapper.
    x2d = x.reshape(rows, hidden)
    w2d = weight.reshape(1, hidden)

    # Default output dtype matches PyTorch promotion of weight * x.to(input_dtype);
    # pass out_dtype=x.dtype to halve store traffic with an f32 weight.
    if out_dtype is None:
        out_dtype = jnp.promote_types(weight.dtype, x.dtype)

    in_itemsize = jnp.dtype(x.dtype).itemsize
    out_itemsize = jnp.dtype(out_dtype).itemsize
    w_itemsize = jnp.dtype(weight.dtype).itemsize

    # Physical VMEM tile geometry: lanes pad to 128, sublanes per packing
    # (8 for 4B, 16 for 2B, 32 for 1B); use the stricter of input/output.
    hidden_p = _round_up(hidden, 128)
    sublane = max(8 * (4 // in_itemsize), 8 * (4 // out_itemsize), 8)

    # Chip-aware VMEM budget for the double-buffered in+out tiles.
    vmem_cap = _vmem_capacity_bytes()
    budget = min(32 * 1024 * 1024, max(8 * 1024 * 1024, vmem_cap // 2 - (8 << 20)))

    row_io_bytes = hidden_p * (in_itemsize + out_itemsize)
    cap_rows = max(sublane, (budget // (2 * row_io_bytes)) // sublane * sublane)
    # Floor: >= ~4 MiB loaded (and ~4 MiB stored) per grid step so the ~0.35 us
    # fixed per-step overhead stays in the noise even at v7x's 3.2 TB/s.
    floor_rows = _round_up(_cdiv(4 << 20, hidden_p * in_itemsize), sublane)
    floor_rows = min(floor_rows, cap_rows)

    rows_aligned = _round_up(rows, sublane)

    if block_rows is None:
        # Never exceed the real row count (small/decode calls stay small).
        block_rows = min(cap_rows, rows_aligned)
        # Prefer the largest EVEN number of grid steps whose blocks still clear
        # the bytes-per-step floor, so v7x's two TCs split the work evenly.
        n_even = (rows // max(floor_rows, 1)) // 2 * 2
        if n_even >= 2:
            cand = _round_up(_cdiv(rows, n_even), sublane)
            block_rows = min(block_rows, max(cand, sublane))
    else:
        block_rows = max(sublane, (int(block_rows) // sublane) * sublane)
        block_rows = min(block_rows, rows_aligned)

    grid = (_cdiv(rows, block_rows),)

    # Explicit VMEM limit from the double-buffered footprint (+headroom);
    # required on v5e (16 MiB default scoped limit), capped at chip capacity.
    footprint = (2 * block_rows * hidden_p * (in_itemsize + out_itemsize)
                 + 2 * 8 * hidden_p * w_itemsize)
    vmem_limit = int(min(vmem_cap, footprint + (4 << 20)))

    out = pl.pallas_call(
        functools.partial(_rmsnorm_kernel, eps=eps, hidden=hidden,
                          mask_lanes=(hidden % 128 != 0)),
        out_shape=jax.ShapeDtypeStruct((rows, hidden), out_dtype),
        grid_spec=pltpu.PrefetchScalarGridSpec(
            num_scalar_prefetch=0,
            grid=grid,
            in_specs=[
                pl.BlockSpec((block_rows, hidden), lambda i: (i, 0)),
                pl.BlockSpec((1, hidden), lambda i: (0, 0)),
            ],
            out_specs=pl.BlockSpec((block_rows, hidden), lambda i: (i, 0)),
        ),
        compiler_params=pltpu.CompilerParams(
            dimension_semantics=("parallel",),
            vmem_limit_bytes=vmem_limit,
        ),
    )(x2d, w2d)

    return out.reshape(orig_shape)


def rmsnorm_ref(x, weight, eps=1e-6):
    input_dtype = x.dtype
    xf = x.astype(jnp.float32)
    variance = jnp.mean(xf * xf, axis=-1, keepdims=True)
    xf = xf * jax.lax.rsqrt(variance + eps)
    return weight * xf.astype(input_dtype)


if __name__ == "__main__":
    key = jax.random.PRNGKey(0)

    # Primary test: shapes implied by the module usage (batch=2, seq=8, hidden=32).
    batch, seq, hidden = 2, 8, 32
    x = jax.random.normal(key, (batch, seq, hidden), dtype=jnp.float32)
    # Deterministic parameter init: RMSNorm weight initialized to ones.
    weight = jnp.ones((hidden,), dtype=jnp.float32)

    out = jax.block_until_ready(rmsnorm(x, weight, eps=1e-6))
    ref = rmsnorm_ref(x, weight, eps=1e-6)
    assert out.shape == x.shape
    assert jnp.allclose(out, ref, atol=1e-5, rtol=1e-5), "mismatch vs reference"

    # Ragged rows + hidden not a multiple of 128 (no host-side padding anymore:
    # exercises the in-kernel lane mask and dropped out-of-bounds row stores).
    x2 = jax.random.normal(jax.random.PRNGKey(1), (7, 100), dtype=jnp.float32)
    w2 = jax.random.normal(jax.random.PRNGKey(2), (100,), dtype=jnp.float32)
    out2 = jax.block_until_ready(rmsnorm(x2, w2, eps=1e-6))
    ref2 = rmsnorm_ref(x2, w2, eps=1e-6)
    assert out2.shape == x2.shape
    assert jnp.allclose(out2, ref2, atol=1e-5, rtol=1e-5), "mismatch vs reference (ragged case)"

    # Multi-step grid with a ragged LAST row-block (forced small block_rows).
    x3 = jax.random.normal(jax.random.PRNGKey(3), (150, 256), dtype=jnp.float32)
    w3 = jax.random.normal(jax.random.PRNGKey(4), (256,), dtype=jnp.float32)
    out3 = jax.block_until_ready(rmsnorm(x3, w3, eps=1e-6, block_rows=64))
    ref3 = rmsnorm_ref(x3, w3, eps=1e-6)
    assert out3.shape == x3.shape
    assert jnp.allclose(out3, ref3, atol=1e-5, rtol=1e-5), "mismatch vs reference (multi-block case)"

    print("KERNEL_OK")
</pallas_src>

<mosaic_0001>
module attributes {stable_mosaic.version = 11 : i64} {
  func.func @_rmsnorm_kernel(%arg0: i32, %arg1: memref<16x32xf32, #tpu.memory_space<vmem>>, %arg2: memref<1x32xf32, #tpu.memory_space<vmem>>, %arg3: memref<16x32xf32, #tpu.memory_space<vmem>>) attributes {dimension_semantics = [#tpu.dimension_semantics<parallel>], iteration_bounds = array<i64: 1>, scalar_prefetch = 0 : i64, scratch_operands = 0 : i64, tpu.core_type = #tpu.core_type<tc>, window_params = [{transform_indices = @transform_0, window_bounds = array<i64: 16, 32>}, {pipeline_mode = #tpu.pipeline_mode<synchronous>, transform_indices = @transform_1, window_bounds = array<i64: 1, 32>}, {transform_indices = @transform_2, window_bounds = array<i64: 16, 32>}]} {
    %c0 = arith.constant 0 : index
    %c0_0 = arith.constant 0 : index
    %0 = vector.load %arg1[%c0, %c0_0] : memref<16x32xf32, #tpu.memory_space<vmem>>, vector<16x32xf32>
    %1 = tpu.iota {dimensions = array<i32: 1>} : vector<16x32xi32>
    %c32_i32 = arith.constant 32 : i32
    %2 = vector.broadcast %c32_i32 : i32 to vector<16x32xi32>
    %3 = arith.cmpi slt, %1, %2 : vector<16x32xi32>
    %cst = arith.constant 0.000000e+00 : f32
    %4 = vector.broadcast %cst : f32 to vector<16x32xf32>
    %5 = arith.select %3, %0, %4 : vector<16x32xi1>, vector<16x32xf32>
    %6 = arith.mulf %5, %5 : vector<16x32xf32>
    %cst_1 = arith.constant dense<0.000000e+00> : vector<16xf32>
    %7 = vector.multi_reduction <add>, %6, %cst_1 [1] : vector<16x32xf32> to vector<16xf32>
    %8 = vector.shape_cast %7 : vector<16xf32> to vector<16x1xf32>
    %cst_2 = arith.constant 3.125000e-02 : f32
    %9 = vector.broadcast %cst_2 : f32 to vector<16x1xf32>
    %10 = arith.mulf %8, %9 : vector<16x1xf32>
    %cst_3 = arith.constant 9.99999997E-7 : f32
    %11 = vector.broadcast %cst_3 : f32 to vector<16x1xf32>
    %12 = arith.addf %10, %11 : vector<16x1xf32>
    %13 = math.rsqrt %12 : vector<16x1xf32>
    %14 = vector.broadcast %13 : vector<16x1xf32> to vector<16x32xf32>
    %15 = arith.mulf %5, %14 : vector<16x32xf32>
    %c0_4 = arith.constant 0 : index
    %c0_5 = arith.constant 0 : index
    %16 = vector.load %arg2[%c0_4, %c0_5] : memref<1x32xf32, #tpu.memory_space<vmem>>, vector<1x32xf32>
    %17 = vector.broadcast %16 : vector<1x32xf32> to vector<16x32xf32>
    %18 = arith.mulf %17, %15 : vector<16x32xf32>
    %c0_6 = arith.constant 0 : index
    %c0_7 = arith.constant 0 : index
    %19 = vector.load %arg3[%c0_6, %c0_7] : memref<16x32xf32, #tpu.memory_space<vmem>>, vector<16x32xf32>
    tpu.vector_store %arg3[%c0_6, %c0_7], %18 {strides = array<i32>} : memref<16x32xf32, #tpu.memory_space<vmem>>, vector<16x32xf32>,
    return
  }
  func.func @transform_0(%arg0: i32) -> (i32, i32) {
    %c0_i32 = arith.constant 0 : i32
    %c0_i32_0 = arith.constant 0 : i32
    return %arg0, %c0_i32 : i32, i32
  }
  func.func @transform_1(%arg0: i32) -> (i32, i32) {
    %c0_i32 = arith.constant 0 : i32
    %c0_i32_0 = arith.constant 0 : i32
    %c0_i32_1 = arith.constant 0 : i32
    return %c0_i32, %c0_i32_0 : i32, i32
  }
  func.func @transform_2(%arg0: i32) -> (i32, i32) {
    %c0_i32 = arith.constant 0 : i32
    %c0_i32_0 = arith.constant 0 : i32
    return %arg0, %c0_i32 : i32, i32
  }
}

</mosaic_0001>

<bundles_post_ra>
// kernel: tpu_custom_call.1
= control target key start
LH: loop header
LB: loop body
LE: loop exit
PB: predicated region body
PF: predicated region fallthrough
CT: control target
= control target key end

     0   :  { %7 = vsyncpa [#allocation3], 0  ;;  %s239_s0 = inlined_call_operand.hbm [shape: f32[16,32], index: 0, kind: input, shape index: {}]   ;;  %s240_s1 = inlined_call_operand.hbm [shape: f32[1,32], index: 1, kind: input, shape index: {}]   ;;  %s241_s2 = inlined_call_operand.hbm [shape: f32[16,32], index: 2, kind: output, shape index: {}]  }
   0x1   :  { %8 = vsyncpa [#allocation6], 0 }
   0x2   :  { %9 = vsyncpa [#allocation4], 0  ;;  %s14_s11 = sshll.u32 %s239_s0, 4  ;;  %s200_s12 = smov [#allocation2]   ;;  %s15_s11 = int_to_ptr.hbm [resolvable:$true] %s14_s11 }
   0x3   :  { %s16_s13 = sshll.u32 %s200_s12, 4  ;;  %s28_s16 = sshll.u32 %s240_s1, 4  ;;  %s17_s13 = int_to_ptr.vmem [resolvable:$true] %s16_s13  ;;  %s29_s16 = int_to_ptr.hbm [resolvable:$true] %s28_s16 }
   0x4   :  { %s201_s17 = smov 128   ;;  %s202_s18 = smov 8  }
   0x5   :  { %22 = dma.hbm_to_vmem [thread:$0]  %s15_s11, 256, %s17_s13, [#allocation3], %s201_s17, %s201_s17, %s202_s18  }
   0x6   :  { %s203_s19 = smov [#allocation5]  }
   0x7   :  { %s30_s20 = sshll.u32 %s203_s19, 4  ;;  %s31_s20 = int_to_ptr.vmem [resolvable:$true] %s30_s20 }
   0x8   :  { %33 = dma.hbm_to_vmem [thread:$0]  %s29_s16, 16, %s31_s20, [#allocation6]  }
   0x9   :  { %194 = dma.done.wait [#allocation3], 256  }
   0xa   :  { %195 = vsyncadd [#allocation3], 4294967040 }
   0xb   :  { %196 = dma.done.wait [#allocation6], 16  }
   0xc   :  { %197 = vsyncadd [#allocation6], 4294967280  ;;  %v44_v0 = vlaneseq  ;;  %v42_v2 = vld [vmem:[#allocation2] sm:$0xff]  ;;  %v43_v3 = vld [vmem:[#allocation2 + $0x8] sm:$0xff]  ;;  %vm51_vm1 = vcmask 261120   ;;  %s204_s0 = smov [#allocation7]  }
   0xd   :  { %v117_v24 = vld [vmem:[#allocation5] ss:$0 sm:$0xff]  ;;  %s96_s1 = sshll.u32 %s204_s0, 4  ;;  %s98_s23 = sshll.u32 %s241_s2, 4  ;;  %s97_s1 = int_to_ptr.vmem [resolvable:$true] %s96_s1  ;;  %s99_s23 = int_to_ptr.hbm [resolvable:$true] %s98_s23 }
   0xe   :  { %v45_v1 = vand.u32 127, %v44_v0 }
  0x10   :  { %vm46_vm0 = vcmp.lt.s32.totalorder %v45_v1, 32 }
  0x11   :  { %v47_v4 = vsel %vm46_vm0, %v42_v2, 0.0  ;;  %v48_v6 = vsel %vm46_vm0, %v43_v3, 0.0 }
  0x12   :  { %v49_v5 = vmul.f32 %v47_v4, %v47_v4  ;;  %v50_v8 = vmul.f32 %v48_v6, %v48_v6 }
  0x14   :  { %v52_v7 = vsel %vm51_vm1, %v49_v5, 0.0  ;;  %v55_v9 = vsel %vm51_vm1, %v50_v8, 0.0 }
  0x15   :  { %53 = vadd.xlane.f32.xlu0 %v52_v7 }
  0x1d   :  { %56 = vadd.xlane.f32.xlu0 %v55_v9 }
  0x88   :  { %v54_v10 = vpop.xlane.xlu0 %53 }
  0x89   :  { %v58_v11 = vmul.f32 0.03125, %v54_v10 }
  0x8b   :  { %v60_v12 = vadd.f32 1e-06, %v58_v11 }
  0x8d   :  { %118 = vrsqrt.f32 %v60_v12  ;;  %vm68_vm3 = vweird.f32 %v60_v12 }
  0x90   :  { %v57_v13 = vpop.xlane.xlu0 %56 }
  0x91   :  { %v59_v14 = vmul.f32 0.03125, %v57_v13 }
  0x93   :  { %v119_v15 = vpop.eup %118  ;;  %v61_v16 = vadd.f32 1e-06, %v59_v14 }
  0x94   :  { %v63_v17 = vmul.f32 %v119_v15, %v60_v12  ;;  %vm69_vm2 = vweird.f32 %v119_v15 }
  0x95   :  { %120 = vrsqrt.f32 %v61_v16  ;;  %vm70_vm4 = vmor %vm68_vm3, %vm69_vm2  ;;  %vm78_vm6 = vweird.f32 %v61_v16 }
  0x96   :  { %v64_v18 = vmul.f32 %v119_v15, %v63_v17 }
  0x98   :  { %v65_v19 = vmul.f32 0.5, %v64_v18 }
  0x9a   :  { %v66_v20 = vsub.f32 1.5, %v65_v19 }
  0x9b   :  { %v121_v21 = vpop.eup %120 }
  0x9c   :  { %v67_v22 = vmul.f32 %v119_v15, %v66_v20  ;;  %v73_v23 = vmul.f32 %v121_v21, %v61_v16  ;;  %vm79_vm5 = vweird.f32 %v121_v21 }
  0x9d   :  { %vm80_vm7 = vmor %vm78_vm6, %vm79_vm5 }
  0x9e   :  { %v71_v25 = vsel %vm70_vm4, %v119_v15, %v67_v22  ;;  %v74_v26 = vmul.f32 %v121_v21, %v73_v23 }
  0x9f   :  { %v82_v27 = vmul.f32 %v71_v25, %v47_v4 }
  0xa0   :  { %v75_v28 = vmul.f32 0.5, %v74_v26 }
  0xa1   :  { %v88_v29 = vmul.f32 %v117_v24, %v82_v27 }
  0xa2   :  { %v76_v30 = vsub.f32 1.5, %v75_v28 }
  0xa3   :  { %90 = vst.msk [vmem:[#allocation7] sm:$0xff] %vm51_vm1, %v88_v29 }
  0xa4   :  { %v77_v31 = vmul.f32 %v121_v21, %v76_v30 }
  0xa6   :  { %v81_v32 = vsel %vm80_vm7, %v121_v21, %v77_v31 }
  0xa7   :  { %v83_v33 = vmul.f32 %v81_v32, %v48_v6 }
  0xa9   :  { %v89_v34 = vmul.f32 %v117_v24, %v83_v33 }
  0xab   :  { %91 = vst.msk [vmem:[#allocation7 + $0x8] sm:$0xff] %vm51_vm1, %v89_v34 }
  0xac   :  { %104 = dma.vmem_to_hbm [thread:$0]  %s97_s1, 256, %s99_s23, [#allocation4], %s201_s17, %s201_s17, %s202_s18  }
  0xad   :  { %198 = dma.done.wait [#allocation4], 256  }
  0xae   :  { %199 = vsyncadd [#allocation4], 4294967040 }
  0xaf   :  { %109 = vsyncpa [#allocation3], 1 }
  0xb0   :  { %110 = vsyncpa [#allocation6], 1 }
  0xb1   :  { %111 = vsyncpa [#allocation4], 1 }

</bundles_post_ra>
